<compile_context>
chip_gen: v7x
topology: tpu7x:2x2x1
jax: 0.10.0
libtpu: 0.0.40
codegen_flags: <defaults>
</compile_context>

<pallas_src>
import functools

import jax
import jax.numpy as jnp
from jax.experimental import pallas as pl
from jax.experimental.pallas import tpu as pltpu

_EPS = 1e-6


def _adain_kernel(c_ref, s_ref, o_ref, *, inv_hw):
    # c_ref, s_ref, o_ref: (ROW_TILE, HW_PAD) tiles in VMEM.
    c = c_ref[...].astype(jnp.float32)
    s = s_ref[...].astype(jnp.float32)

    # First / second moments from plain sums. Zero-padded lanes contribute 0
    # to both sums, so dividing by the *true* H*W (inv_hw) stays exact. This
    # breaks the reduce -> broadcast-subtract -> reduce chain and avoids
    # materializing centered full-tile temporaries.
    c_sum = jnp.sum(c, axis=-1, keepdims=True)
    c_sumsq = jnp.sum(c * c, axis=-1, keepdims=True)
    s_sum = jnp.sum(s, axis=-1, keepdims=True)
    s_sumsq = jnp.sum(s * s, axis=-1, keepdims=True)

    c_mean = c_sum * inv_hw
    c_var = jnp.maximum(c_sumsq * inv_hw - c_mean * c_mean, 0.0)
    s_mean = s_sum * inv_hw
    s_var = jnp.maximum(s_sumsq * inv_hw - s_mean * s_mean, 0.0)

    # Per-row affine: out = c * scale + shift  (matches
    # (c - c_mean) / sqrt(c_var + eps) * sqrt(s_var + eps) + s_mean).
    s_std = jnp.sqrt(s_var + _EPS)
    scale = s_std * jax.lax.rsqrt(c_var + _EPS)
    shift = s_mean - scale * c_mean

    o_ref[...] = (c * scale + shift).astype(o_ref.dtype)


def _round_up(x, m):
    return ((x + m - 1) // m) * m


def _vmem_capacity_bytes():
    try:
        return int(pltpu.get_tpu_info().vmem_capacity_bytes)
    except Exception:
        return 64 * 1024 * 1024  # conservative default (v7x per-core VMEM)


@functools.partial(jax.jit, static_argnames=("disabled",))
def adain(contentf, stylef, *, disabled=False):
    """AdaIN forward. contentf / stylef: (N, C, H, W) arrays, same shape."""
    if disabled:
        return contentf

    N, C, H, W = contentf.shape
    assert stylef.shape == contentf.shape
    rows = N * C
    hw = H * W

    # Pad to an (8, 128)-aligned slab: keeps every block legal, keeps the
    # output lane axis dense (unmasked stores), and keeps the grid multi-step.
    rows_pad = _round_up(rows, 8)
    hw_pad = _round_up(hw, 128)

    c2d = contentf.reshape(rows, hw)
    s2d = stylef.reshape(rows, hw)
    if rows_pad != rows or hw_pad != hw:
        pad = ((0, rows_pad - rows), (0, hw_pad - hw))
        c2d = jnp.pad(c2d, pad)
        s2d = jnp.pad(s2d, pad)

    in_bytes = jnp.dtype(contentf.dtype).itemsize
    out_bytes = in_bytes

    # VMEM-budget-aware row tile: 2 inputs + 1 output, double-buffered, plus
    # margin for in-kernel f32 temporaries (cast copy + x*x).
    vmem_cap = _vmem_capacity_bytes()
    tile_budget = int(vmem_cap * 0.45)
    bytes_per_row = (
        2 * hw_pad * (2 * in_bytes + out_bytes)  # double-buffered pipeline tiles
        + 2 * hw_pad * 4                         # in-kernel f32 temporaries
    )
    row_tile = (tile_budget // bytes_per_row) // 8 * 8
    row_tile = max(8, min(row_tile, rows_pad, 1024))

    grid = (pl.cdiv(rows_pad, row_tile),)

    # Scoped-VMEM limit sized to the tile plan (default scoped limits are only
    # 16 MiB on v5e / 32 MiB on v6e & v7x).
    needed = 2 * row_tile * hw_pad * (2 * in_bytes + out_bytes)
    vmem_limit = needed + max(needed // 2, 16 << 20)
    vmem_limit = max(min(vmem_limit, int(vmem_cap * 0.9)), 16 << 20)

    kernel = functools.partial(_adain_kernel, inv_hw=1.0 / float(hw))

    out2d = pl.pallas_call(
        kernel,
        out_shape=jax.ShapeDtypeStruct((rows_pad, hw_pad), contentf.dtype),
        grid_spec=pltpu.PrefetchScalarGridSpec(
            num_scalar_prefetch=0,
            grid=grid,
            in_specs=[
                pl.BlockSpec((row_tile, hw_pad), lambda i: (i, 0)),
                pl.BlockSpec((row_tile, hw_pad), lambda i: (i, 0)),
            ],
            out_specs=pl.BlockSpec((row_tile, hw_pad), lambda i: (i, 0)),
        ),
        compiler_params=pltpu.CompilerParams(
            dimension_semantics=("parallel",),
            vmem_limit_bytes=vmem_limit,
        ),
    )(c2d, s2d)

    return out2d[:rows, :hw].reshape(N, C, H, W)


def _adain_ref(contentf, stylef):
    """Pure-JAX reference mirroring the PyTorch forward exactly."""
    N, C, H, W = contentf.shape
    cv = contentf.reshape(N, C, -1)
    cm = cv.mean(-1, keepdims=True)
    cc = cv - cm
    cs = jnp.sqrt((cc ** 2).mean(-1, keepdims=True) + _EPS)
    sv = stylef.reshape(N, C, -1)
    sm = sv.mean(-1, keepdims=True)
    sc = sv - sm
    ss = jnp.sqrt((sc ** 2).mean(-1, keepdims=True) + _EPS)
    out = (cv - cm) / cs * ss + sm
    return out.reshape(N, C, H, W)


if __name__ == "__main__":
    key = jax.random.PRNGKey(0)

    # Aligned toy shape.
    k1, k2, k3, k4 = jax.random.split(key, 4)
    N, C, H, W = 2, 4, 16, 16
    contentf = jax.random.normal(k1, (N, C, H, W), dtype=jnp.float32)
    stylef = jax.random.normal(k2, (N, C, H, W), dtype=jnp.float32) * 2.0 + 0.5

    out = jax.block_until_ready(adain(contentf, stylef))
    ref = _adain_ref(contentf, stylef)
    assert out.shape == (N, C, H, W)
    assert jnp.allclose(out, ref, atol=1e-4, rtol=1e-4), "mismatch vs reference"

    # Ragged shape (exercises row / lane padding paths).
    c2 = jax.random.normal(k3, (1, 3, 7, 9), dtype=jnp.float32)
    s2 = jax.random.normal(k4, (1, 3, 7, 9), dtype=jnp.float32) * 0.7 - 1.0
    out2 = jax.block_until_ready(adain(c2, s2))
    ref2 = _adain_ref(c2, s2)
    assert out2.shape == c2.shape
    assert jnp.allclose(out2, ref2, atol=1e-4, rtol=1e-4), "ragged mismatch"

    # disabled=True path is identity.
    outd = jax.block_until_ready(adain(contentf, stylef, disabled=True))
    assert jnp.array_equal(outd, contentf)

    print("KERNEL_OK")
</pallas_src>

<mosaic_0001>
module attributes {stable_mosaic.version = 11 : i64} {
  func.func @_adain_kernel(%arg0: i32, %arg1: memref<8x256xf32, #tpu.memory_space<vmem>>, %arg2: memref<8x256xf32, #tpu.memory_space<vmem>>, %arg3: memref<8x256xf32, #tpu.memory_space<vmem>>) attributes {dimension_semantics = [#tpu.dimension_semantics<parallel>], iteration_bounds = array<i64: 1>, scalar_prefetch = 0 : i64, scratch_operands = 0 : i64, tpu.core_type = #tpu.core_type<tc>, window_params = [{transform_indices = @transform_0, window_bounds = array<i64: 8, 256>}, {transform_indices = @transform_1, window_bounds = array<i64: 8, 256>}, {transform_indices = @transform_2, window_bounds = array<i64: 8, 256>}]} {
    %c0 = arith.constant 0 : index
    %c0_0 = arith.constant 0 : index
    %0 = vector.load %arg1[%c0, %c0_0] : memref<8x256xf32, #tpu.memory_space<vmem>>, vector<8x256xf32>
    %c0_1 = arith.constant 0 : index
    %c0_2 = arith.constant 0 : index
    %1 = vector.load %arg2[%c0_1, %c0_2] : memref<8x256xf32, #tpu.memory_space<vmem>>, vector<8x256xf32>
    %cst = arith.constant dense<0.000000e+00> : vector<8xf32>
    %2 = vector.multi_reduction <add>, %0, %cst [1] : vector<8x256xf32> to vector<8xf32>
    %3 = vector.shape_cast %2 : vector<8xf32> to vector<8x1xf32>
    %4 = arith.mulf %0, %0 : vector<8x256xf32>
    %cst_3 = arith.constant dense<0.000000e+00> : vector<8xf32>
    %5 = vector.multi_reduction <add>, %4, %cst_3 [1] : vector<8x256xf32> to vector<8xf32>
    %6 = vector.shape_cast %5 : vector<8xf32> to vector<8x1xf32>
    %cst_4 = arith.constant dense<0.000000e+00> : vector<8xf32>
    %7 = vector.multi_reduction <add>, %1, %cst_4 [1] : vector<8x256xf32> to vector<8xf32>
    %8 = vector.shape_cast %7 : vector<8xf32> to vector<8x1xf32>
    %9 = arith.mulf %1, %1 : vector<8x256xf32>
    %cst_5 = arith.constant dense<0.000000e+00> : vector<8xf32>
    %10 = vector.multi_reduction <add>, %9, %cst_5 [1] : vector<8x256xf32> to vector<8xf32>
    %11 = vector.shape_cast %10 : vector<8xf32> to vector<8x1xf32>
    %cst_6 = arith.constant 3.906250e-03 : f32
    %12 = vector.broadcast %cst_6 : f32 to vector<8x1xf32>
    %13 = arith.mulf %3, %12 : vector<8x1xf32>
    %cst_7 = arith.constant 3.906250e-03 : f32
    %14 = vector.broadcast %cst_7 : f32 to vector<8x1xf32>
    %15 = arith.mulf %6, %14 : vector<8x1xf32>
    %16 = arith.mulf %13, %13 : vector<8x1xf32>
    %17 = arith.subf %15, %16 : vector<8x1xf32>
    %cst_8 = arith.constant 0.000000e+00 : f32
    %18 = vector.broadcast %cst_8 : f32 to vector<8x1xf32>
    %19 = arith.maximumf %17, %18 : vector<8x1xf32>
    %cst_9 = arith.constant 3.906250e-03 : f32
    %20 = vector.broadcast %cst_9 : f32 to vector<8x1xf32>
    %21 = arith.mulf %8, %20 : vector<8x1xf32>
    %cst_10 = arith.constant 3.906250e-03 : f32
    %22 = vector.broadcast %cst_10 : f32 to vector<8x1xf32>
    %23 = arith.mulf %11, %22 : vector<8x1xf32>
    %24 = arith.mulf %21, %21 : vector<8x1xf32>
    %25 = arith.subf %23, %24 : vector<8x1xf32>
    %cst_11 = arith.constant 0.000000e+00 : f32
    %26 = vector.broadcast %cst_11 : f32 to vector<8x1xf32>
    %27 = arith.maximumf %25, %26 : vector<8x1xf32>
    %cst_12 = arith.constant 9.99999997E-7 : f32
    %28 = vector.broadcast %cst_12 : f32 to vector<8x1xf32>
    %29 = arith.addf %27, %28 : vector<8x1xf32>
    %30 = math.sqrt %29 : vector<8x1xf32>
    %cst_13 = arith.constant 9.99999997E-7 : f32
    %31 = vector.broadcast %cst_13 : f32 to vector<8x1xf32>
    %32 = arith.addf %19, %31 : vector<8x1xf32>
    %33 = math.rsqrt %32 : vector<8x1xf32>
    %34 = arith.mulf %30, %33 : vector<8x1xf32>
    %35 = arith.mulf %34, %13 : vector<8x1xf32>
    %36 = arith.subf %21, %35 : vector<8x1xf32>
    %37 = vector.broadcast %34 : vector<8x1xf32> to vector<8x256xf32>
    %38 = arith.mulf %0, %37 : vector<8x256xf32>
    %39 = vector.broadcast %36 : vector<8x1xf32> to vector<8x256xf32>
    %40 = arith.addf %38, %39 : vector<8x256xf32>
    %c0_14 = arith.constant 0 : index
    %c0_15 = arith.constant 0 : index
    %41 = vector.load %arg3[%c0_14, %c0_15] : memref<8x256xf32, #tpu.memory_space<vmem>>, vector<8x256xf32>
    tpu.vector_store %arg3[%c0_14, %c0_15], %40 {strides = array<i32>} : memref<8x256xf32, #tpu.memory_space<vmem>>, vector<8x256xf32>,
    return
  }
  func.func @transform_0(%arg0: i32) -> (i32, i32) {
    %c0_i32 = arith.constant 0 : i32
    %c0_i32_0 = arith.constant 0 : i32
    return %arg0, %c0_i32 : i32, i32
  }
  func.func @transform_1(%arg0: i32) -> (i32, i32) {
    %c0_i32 = arith.constant 0 : i32
    %c0_i32_0 = arith.constant 0 : i32
    return %arg0, %c0_i32 : i32, i32
  }
  func.func @transform_2(%arg0: i32) -> (i32, i32) {
    %c0_i32 = arith.constant 0 : i32
    %c0_i32_0 = arith.constant 0 : i32
    return %arg0, %c0_i32 : i32, i32
  }
}

</mosaic_0001>

<bundles_post_ra>
// kernel: adain.1
= control target key start
LH: loop header
LB: loop body
LE: loop exit
PB: predicated region body
PF: predicated region fallthrough
CT: control target
= control target key end

     0   :  { %s101_s1 = inlined_call_operand.vmem [shape: f32[8,256], index: 1, kind: input, shape index: {}]   ;;  %s102_s0 = inlined_call_operand.vmem [shape: f32[8,256], index: 0, kind: input, shape index: {}]   ;;  %s103_s2 = inlined_call_operand.vmem [shape: f32[8,256], index: 2, kind: output, shape index: {}]  }
   0x1   :  { %v13_v0 = vld [vmem:[%s101_s1] sm:$0xff]  ;;  %v14_v1 = vld [vmem:[%s101_s1 + $0x8] sm:$0xff] }
   0x2   :  { %v11_v2 = vld [vmem:[%s102_s0] sm:$0xff]  ;;  %v23_v3 = vadd.f32 %v14_v1, %v13_v0  ;;  %v26_v4 = vmul.f32 %v13_v0, %v13_v0  ;;  %v27_v5 = vmul.f32 %v14_v1, %v14_v1  ;;  %v12_v6 = vld [vmem:[%s102_s0 + $0x8] sm:$0xff] }
   0x3   :  { %v18_v7 = vmul.f32 %v11_v2, %v11_v2  ;;  %v15_v8 = vadd.f32 %v12_v6, %v11_v2  ;;  %v19_v9 = vmul.f32 %v12_v6, %v12_v6 }
   0x4   :  { %24 = vadd.xlane.f32.xlu0 %v23_v3  ;;  %v28_v10 = vadd.f32 %v27_v5, %v26_v4 }
   0x5   :  { %16 = vadd.xlane.f32.xlu1 %v15_v8  ;;  %v20_v11 = vadd.f32 %v19_v9, %v18_v7 }
   0x8   :  { %29 = vadd.xlane.f32.xlu0 %v28_v10 }
   0x9   :  { %21 = vadd.xlane.f32.xlu1 %v20_v11 }
  0x91   :  { %v25_v12 = vpop.xlane.xlu0 %24 }
  0x92   :  { %v36_v13 = vmul.f32 0.00390625, %v25_v12  ;;  %v17_v14 = vpop.xlane.xlu1 %16 }
  0x93   :  { %v31_v15 = vmul.f32 0.00390625, %v17_v14 }
  0x94   :  { %v38_v18 = vmul.f32 %v36_v13, %v36_v13 }
  0x95   :  { %v33_v16 = vmul.f32 %v31_v15, %v31_v15  ;;  %v30_v17 = vpop.xlane.xlu0 %29 }
  0x96   :  { %v37_v19 = vmul.f32 0.00390625, %v30_v17  ;;  %v22_v20 = vpop.xlane.xlu1 %21 }
  0x97   :  { %v32_v21 = vmul.f32 0.00390625, %v22_v20 }
  0x98   :  { %v39_v22 = vsub.f32 %v37_v19, %v38_v18 }
  0x99   :  { %v34_v23 = vsub.f32 %v32_v21, %v33_v16 }
  0x9a   :  { %v40_v24 = vmax.f32 %v39_v22, 0.0 }
  0x9b   :  { %v35_v25 = vmax.f32 %v34_v23, 0.0 }
  0x9c   :  { %v41_v26 = vadd.f32 1e-06, %v40_v24 }
  0x9d   :  { %v49_v27 = vadd.f32 1e-06, %v35_v25 }
  0x9e   :  { %64 = vrsqrt.f32 %v41_v26  ;;  %vm44_vm0 = vcmp.eq.f32.partialorder %v41_v26, inf  ;;  %v47_v30 = vand.u32 2147483648, %v41_v26  ;;  %vm46_vm1 = vcmp.eq.f32.partialorder %v41_v26, 0.0 }
  0x9f   :  { %66 = vrsqrt.f32 %v49_v27 }
  0xa8   :  { %v65_v28 = vpop.eup %64 }
  0xa9   :  { %v43_v29 = vmul.f32 %v65_v28, %v41_v26  ;;  %v67_v32 = vpop.eup %66 }
  0xab   :  { %v45_v31 = vsel %vm44_vm0, %v41_v26, %v43_v29 }
  0xac   :  { %v48_v33 = vsel %vm46_vm1, %v47_v30, %v45_v31 }
  0xad   :  { %v51_v34 = vmul.f32 %v67_v32, %v48_v33 }
  0xaf   :  { %v52_v35 = vmul.f32 %v51_v34, %v31_v15  ;;  %v54_v37 = vmul.f32 %v51_v34, %v11_v2  ;;  %v55_v38 = vmul.f32 %v51_v34, %v12_v6 }
  0xb1   :  { %v53_v36 = vsub.f32 %v36_v13, %v52_v35 }
  0xb3   :  { %v56_v39 = vadd.f32 %v54_v37, %v53_v36  ;;  %v57_v40 = vadd.f32 %v55_v38, %v53_v36 }
  0xb5   :  { %58 = vst [vmem:[%s103_s2] sm:$0xff] %v56_v39  ;;  %59 = vst [vmem:[%s103_s2 + $0x8] sm:$0xff] %v57_v40 }

</bundles_post_ra>
